<compile_context>
chip_gen: v7x
topology: tpu7x:2x2x1
jax: 0.10.0
libtpu: 0.0.40
codegen_flags: <defaults>
</compile_context>

<pallas_src>
import functools

import jax
import jax.numpy as jnp
from jax.experimental import pallas as pl
from jax.experimental.pallas import tpu as pltpu

EPS = 1e-8
# ~1 MiB of f32 per input block -> 2 inputs x 2 pipeline buffers ~ 4 MiB VMEM.
DEFAULT_BLOCK_ELEMS = 256 * 1024


def _gce_partial_kernel(wh_ref, wl_ref, out_ref, *, eps):
    """Per-block partial of S = sum(h*log(w) + (1-h)*log(1-w)), w = W_low+eps."""
    h = wh_ref[...]                       # W_high + eps (precomputed, f32)
    w = wl_ref[...] + eps                 # W_low + eps
    log_w = jnp.log(w)
    log_1mw = jnp.log(1.0 - w)
    # h*log_w + (1-h)*log_1mw  ==  log_1mw + h*(log_w - log_1mw)
    s = jnp.sum(log_1mw + h * (log_w - log_1mw))
    out_ref[...] = jnp.broadcast_to(s, out_ref.shape)


def make_graph_cross_entropy_loss(high_graph, eps=EPS,
                                  block_elems=DEFAULT_BLOCK_ELEMS):
    """Mirrors GraphCrossEntropyLoss.__init__ / forward."""
    high = jnp.asarray(high_graph, jnp.float32)
    if high.ndim != 2:
        high = high.reshape(1, -1)        # fall back to a single-row layout
    n_rows, n_cols = high.shape
    n_total = n_rows * n_cols

    wh = high + eps                                   # stored once (module init)
    # Constant entropy of W_high, hoisted out of the per-call kernel.
    k_const = jnp.sum(wh * jnp.log(wh) + (1.0 - wh) * jnp.log(1.0 - wh))

    # --- static tiling decision --------------------------------------------
    if n_total <= block_elems or n_rows < 16:
        block_rows = n_rows                           # one full-array block
    else:
        block_rows = max(8, min((block_elems // n_cols) // 8 * 8,
                                (n_rows // 8) * 8))
    grid_rows = n_rows // block_rows                  # full blocks only
    main_rows = grid_rows * block_rows
    tail_rows = n_rows - main_rows                    # summed in the wrapper

    kernel = functools.partial(_gce_partial_kernel, eps=eps)
    pallas_fn = pl.pallas_call(
        kernel,
        out_shape=jax.ShapeDtypeStruct((grid_rows, 8, 128), jnp.float32),
        grid_spec=pltpu.PrefetchScalarGridSpec(
            num_scalar_prefetch=0,
            grid=(grid_rows,),
            in_specs=[
                pl.BlockSpec((block_rows, n_cols), lambda i: (i, 0)),
                pl.BlockSpec((block_rows, n_cols), lambda i: (i, 0)),
            ],
            out_specs=pl.BlockSpec((1, 8, 128), lambda i: (i, 0, 0)),
        ),
        compiler_params=pltpu.CompilerParams(
            dimension_semantics=("parallel",)),
    )

    @jax.jit
    def _loss_impl(wh_2d, k, w_low):
        wl = jnp.asarray(w_low, jnp.float32).reshape(wh_2d.shape)
        partials = pallas_fn(wh_2d, wl)               # (grid_rows, 8, 128)
        s = jnp.sum(partials[:, 0, 0])
        if tail_rows:                                 # static Python branch
            h_t = wh_2d[main_rows:, :]
            w_t = wl[main_rows:, :] + eps
            log_w = jnp.log(w_t)
            log_1mw = jnp.log(1.0 - w_t)
            s = s + jnp.sum(log_1mw + h_t * (log_w - log_1mw))
        return (k - s) / jnp.float32(n_total)

    def loss_fn(w_low):
        return _loss_impl(wh, k_const, w_low)

    return loss_fn


def _reference_loss(high_graph, w_low, eps=EPS):
    wh = high_graph.reshape(-1).astype(jnp.float32) + eps
    wl = w_low.reshape(-1).astype(jnp.float32) + eps
    loss1 = jnp.mean(wh * jnp.log(wh / wl))
    loss2 = jnp.mean((1.0 - wh) * jnp.log((1.0 - wh) / (1.0 - wl)))
    return loss1 + loss2


if __name__ == "__main__":
    key = jax.random.PRNGKey(0)

    def _case(n_nodes, block_elems, subkey):
        k1, k2 = jax.random.split(subkey)
        high = jax.random.uniform(k1, (n_nodes, n_nodes), jnp.float32,
                                  minval=0.05, maxval=0.95)
        w_low = jax.random.uniform(k2, (n_nodes, n_nodes), jnp.float32,
                                   minval=0.05, maxval=0.95)
        loss_fn = make_graph_cross_entropy_loss(high, block_elems=block_elems)
        loss = loss_fn(w_low)
        jax.block_until_ready(loss)
        ref = _reference_loss(high, w_low)
        assert jnp.allclose(loss, ref, rtol=1e-4, atol=1e-6), (n_nodes, loss, ref)
        return loss

    keys = jax.random.split(key, 3)
    # (48, 48): single full-array block (grid = 1).
    _case(48, DEFAULT_BLOCK_ELEMS, keys[0])
    # (64, 64) with a tiny block budget: multi-block parallel grid, no tail.
    _case(64, 2048, keys[1])
    # (52, 52) with a tiny block budget: multi-block grid + ragged tail rows.
    _case(52, 1024, keys[2])

    print("KERNEL_OK")
</pallas_src>

<mosaic_0001>
module attributes {stable_mosaic.version = 11 : i64} {
  func.func @_gce_partial_kernel(%arg0: i32, %arg1: memref<48x48xf32, #tpu.memory_space<vmem>>, %arg2: memref<48x48xf32, #tpu.memory_space<vmem>>, %arg3: memref<1x8x128xf32, #tpu.memory_space<vmem>>) attributes {dimension_semantics = [#tpu.dimension_semantics<parallel>], iteration_bounds = array<i64: 1>, scalar_prefetch = 0 : i64, scratch_operands = 0 : i64, tpu.core_type = #tpu.core_type<tc>, window_params = [{transform_indices = @transform_0, window_bounds = array<i64: 48, 48>}, {transform_indices = @transform_1, window_bounds = array<i64: 48, 48>}, {transform_indices = @transform_2, window_bounds = array<i64: 1, 8, 128>}]} {
    %c0 = arith.constant 0 : index
    %c0_0 = arith.constant 0 : index
    %0 = vector.load %arg1[%c0, %c0_0] : memref<48x48xf32, #tpu.memory_space<vmem>>, vector<48x48xf32>
    %c0_1 = arith.constant 0 : index
    %c0_2 = arith.constant 0 : index
    %1 = vector.load %arg2[%c0_1, %c0_2] : memref<48x48xf32, #tpu.memory_space<vmem>>, vector<48x48xf32>
    %cst = arith.constant 9.99999993E-9 : f32
    %2 = vector.broadcast %cst : f32 to vector<48x48xf32>
    %3 = arith.addf %1, %2 : vector<48x48xf32>
    %4 = math.log %3 : vector<48x48xf32>
    %cst_3 = arith.constant 1.000000e+00 : f32
    %5 = vector.broadcast %cst_3 : f32 to vector<48x48xf32>
    %6 = arith.subf %5, %3 : vector<48x48xf32>
    %7 = math.log %6 : vector<48x48xf32>
    %8 = arith.subf %4, %7 : vector<48x48xf32>
    %9 = arith.mulf %0, %8 : vector<48x48xf32>
    %10 = arith.addf %7, %9 : vector<48x48xf32>
    %11 = vector.shape_cast %10 : vector<48x48xf32> to vector<1x48x48xf32>
    %cst_4 = arith.constant dense<0.000000e+00> : vector<1xf32>
    %12 = vector.multi_reduction <add>, %11, %cst_4 [1, 2] : vector<1x48x48xf32> to vector<1xf32>
    %13 = vector.shape_cast %12 : vector<1xf32> to vector<1x1x1xf32>
    %14 = vector.extract %13[0, 0, 0] : f32 from vector<1x1x1xf32>
    %15 = vector.broadcast %14 : f32 to vector<1x8x128xf32>
    %c0_5 = arith.constant 0 : index
    %c0_6 = arith.constant 0 : index
    %c0_7 = arith.constant 0 : index
    %16 = vector.load %arg3[%c0_5, %c0_6, %c0_7] : memref<1x8x128xf32, #tpu.memory_space<vmem>>, vector<1x8x128xf32>
    tpu.vector_store %arg3[%c0_5, %c0_6, %c0_7], %15 {strides = array<i32>} : memref<1x8x128xf32, #tpu.memory_space<vmem>>, vector<1x8x128xf32>,
    return
  }
  func.func @transform_0(%arg0: i32) -> (i32, i32) {
    %c0_i32 = arith.constant 0 : i32
    %c0_i32_0 = arith.constant 0 : i32
    return %arg0, %c0_i32 : i32, i32
  }
  func.func @transform_1(%arg0: i32) -> (i32, i32) {
    %c0_i32 = arith.constant 0 : i32
    %c0_i32_0 = arith.constant 0 : i32
    return %arg0, %c0_i32 : i32, i32
  }
  func.func @transform_2(%arg0: i32) -> (i32, i32, i32) {
    %c0_i32 = arith.constant 0 : i32
    %c0_i32_0 = arith.constant 0 : i32
    %c0_i32_1 = arith.constant 0 : i32
    return %arg0, %c0_i32, %c0_i32_0 : i32, i32, i32
  }
}

</mosaic_0001>

<bundles_post_ra>
// kernel: _loss_impl.1
= control target key start
LH: loop header
LB: loop body
LE: loop exit
PB: predicated region body
PF: predicated region fallthrough
CT: control target
= control target key end

     0   :  { %7 = vsyncpa [#allocation3], 0  ;;  %s264_s0 = inlined_call_operand.hbm [shape: f32[48,48], index: 0, kind: input, shape index: {}]   ;;  %s265_s1 = inlined_call_operand.hbm [shape: f32[48,48], index: 1, kind: input, shape index: {}]   ;;  %s266_s2 = inlined_call_operand.vmem [shape: f32[1,8,128], index: 2, kind: output, shape index: {}]  }
   0x1   :  { %8 = vsyncpa [#allocation5], 0  ;;  %s212_s9 = smov [#allocation2]   ;;  %s164_s13 = scalar_lea.hbm %s264_s0, 768 }
   0x2   :  { %s14_s10 = sshll.u32 %s212_s9, 4  ;;  %p165_p0 = scmp.ne.s32.totalorder %s264_s0, %s164_s13  ;;  %s15_s10 = int_to_ptr.vmem [resolvable:$true] %s14_s10 }
   0x3   :  { %p168_p1 = scmp.lt.u32.totalorder %s164_s13, %s264_s0 }
   0x5   :  { %p170_p2 = pnand %p168_p1, %p165_p0 }
   0x7   :  { %173 = shalt.err (!%p170_p2)
}
   0x8   :  { %s174_s18 = scalar_lea.vmem %s15_s10, 768  ;;  %p179_p4 = scmp.lt.s32.totalorder %s15_s10, %s15_s10 }
   0x9   :  { %p175_p3 = scmp.ne.s32.totalorder %s15_s10, %s174_s18  ;;  %p180_p5 = scmp.lt.s32.totalorder %s174_s18, %s174_s18 }
   0xb   :  { %p181_p6 = por %p180_p5, %p179_p4 }
   0xd   :  { %p182_p7 = pnand %p181_p6, %p175_p3 }
   0xf   :  { %185 = shalt.err (!%p182_p7)
}
  0x10   :  { %s213_s19 = smov 128   ;;  %s214_s20 = smov 8  }
  0x11   :  { %20 = dma.hbm_to_vmem [thread:$0]  %s264_s0, 768, %s15_s10, [#allocation3], %s213_s19, %s213_s19, %s214_s20  }
  0x12   :  { %s215_s23 = smov [#allocation4]   ;;  %s186_s27 = scalar_lea.hbm %s265_s1, 768 }
  0x13   :  { %s26_s24 = sshll.u32 %s215_s23, 4  ;;  %p187_p8 = scmp.ne.s32.totalorder %s265_s1, %s186_s27  ;;  %s27_s24 = int_to_ptr.vmem [resolvable:$true] %s26_s24 }
  0x14   :  { %p190_p9 = scmp.lt.u32.totalorder %s186_s27, %s265_s1 }
  0x16   :  { %p192_p10 = pnand %p190_p9, %p187_p8 }
  0x18   :  { %195 = shalt.err (!%p192_p10)
}
  0x19   :  { %s196_s4 = scalar_lea.vmem %s27_s24, 768  ;;  %p201_p12 = scmp.lt.s32.totalorder %s27_s24, %s27_s24 }
  0x1a   :  { %p197_p11 = scmp.ne.s32.totalorder %s27_s24, %s196_s4  ;;  %p202_p13 = scmp.lt.s32.totalorder %s196_s4, %s196_s4 }
  0x1c   :  { %p203_p0 = por %p202_p13, %p201_p12 }
  0x1e   :  { %p204_p1 = pnand %p203_p0, %p197_p11 }
  0x20   :  { %207 = shalt.err (!%p204_p1)
}
  0x21   :  { %32 = dma.hbm_to_vmem [thread:$0]  %s265_s1, 768, %s27_s24, [#allocation5], %s213_s19, %s213_s19, %s214_s20  }
  0x22   :  { %208 = dma.done.wait [#allocation3], 768  }
  0x23   :  { %209 = vsyncadd [#allocation3], 4294966528 }
  0x24   :  { %210 = dma.done.wait [#allocation5], 768  }
  0x25   :  { %211 = vsyncadd [#allocation5], 4294966528  ;;  %v45_v0 = vld [vmem:[#allocation4] sm:$0xff]  ;;  %v46_v1 = vld [vmem:[#allocation4 + $0x8] sm:$0xff]  ;;  %vm105_vm0 = vcmask 392192  }
  0x26   :  { %v47_v2 = vld [vmem:[#allocation4 + $0x10] sm:$0xff]  ;;  %v48_v3 = vld [vmem:[#allocation4 + $0x18] sm:$0xff]  ;;  %v51_v4 = vadd.f32 1e-08, %v45_v0  ;;  %v49_v5 = vld [vmem:[#allocation4 + $0x20] sm:$0xff] }
  0x27   :  { %v52_v6 = vadd.f32 1e-08, %v46_v1  ;;  %v50_v7 = vld [vmem:[#allocation4 + $0x28] sm:$0xff]  ;;  %v53_v8 = vadd.f32 1e-08, %v47_v2  ;;  %v39_v31 = vld [vmem:[#allocation2] sm:$0xff] }
  0x28   :  { %140 = vlog2.f32 %v51_v4  ;;  %v54_v9 = vadd.f32 1e-08, %v48_v3  ;;  %v55_v10 = vadd.f32 1e-08, %v49_v5  ;;  %v69_v11 = vsub.f32 1.0, %v51_v4  ;;  %v40_v35 = vld [vmem:[#allocation2 + $0x8] sm:$0xff] }
  0x29   :  { %142 = vlog2.f32 %v52_v6  ;;  %v56_v12 = vadd.f32 1e-08, %v50_v7  ;;  %v70_v13 = vsub.f32 1.0, %v52_v6  ;;  %v71_v14 = vsub.f32 1.0, %v53_v8  ;;  %v41_v40 = vld [vmem:[#allocation2 + $0x10] sm:$0xff]  ;;  %v42_v45 = vld [vmem:[#allocation2 + $0x18] sm:$0xff] }
  0x2a   :  { %144 = vlog2.f32 %v53_v8  ;;  %v72_v15 = vsub.f32 1.0, %v54_v9  ;;  %v73_v16 = vsub.f32 1.0, %v55_v10  ;;  %v43_v49 = vld [vmem:[#allocation2 + $0x20] sm:$0xff]  ;;  %v44_v53 = vld [vmem:[#allocation2 + $0x28] sm:$0xff] }
  0x2b   :  { %146 = vlog2.f32 %v54_v9  ;;  %v74_v17 = vsub.f32 1.0, %v56_v12 }
  0x2c   :  { %148 = vlog2.f32 %v55_v10 }
  0x2d   :  { %150 = vlog2.f32 %v56_v12 }
  0x2e   :  { %152 = vlog2.f32 %v69_v11 }
  0x2f   :  { %154 = vlog2.f32 %v70_v13 }
  0x30   :  { %156 = vlog2.f32 %v71_v14 }
  0x31   :  { %158 = vlog2.f32 %v72_v15 }
  0x32   :  { %v141_v18 = vpop.eup %140  ;;  %160 = vlog2.f32 %v73_v16 }
  0x33   :  { %v143_v19 = vpop.eup %142  ;;  %162 = vlog2.f32 %v74_v17  ;;  %v58_v24 = vmul.f32 0.6931472, %v141_v18 }
  0x34   :  { %v145_v20 = vpop.eup %144  ;;  %v60_v26 = vmul.f32 0.6931472, %v143_v19 }
  0x35   :  { %v147_v21 = vpop.eup %146  ;;  %v62_v28 = vmul.f32 0.6931472, %v145_v20 }
  0x36   :  { %v149_v22 = vpop.eup %148  ;;  %v64_v32 = vmul.f32 0.6931472, %v147_v21 }
  0x37   :  { %v151_v23 = vpop.eup %150  ;;  %v66_v36 = vmul.f32 0.6931472, %v149_v22 }
  0x38   :  { %v153_v25 = vpop.eup %152  ;;  %v68_v41 = vmul.f32 0.6931472, %v151_v23 }
  0x39   :  { %v155_v27 = vpop.eup %154  ;;  %v76_v29 = vmul.f32 0.6931472, %v153_v25 }
  0x3a   :  { %v157_v30 = vpop.eup %156  ;;  %v78_v33 = vmul.f32 0.6931472, %v155_v27 }
  0x3b   :  { %v159_v34 = vpop.eup %158  ;;  %v80_v37 = vmul.f32 0.6931472, %v157_v30  ;;  %v87_v38 = vsub.f32 %v58_v24, %v76_v29 }
  0x3c   :  { %v161_v39 = vpop.eup %160  ;;  %v82_v42 = vmul.f32 0.6931472, %v159_v34  ;;  %v88_v43 = vsub.f32 %v60_v26, %v78_v33 }
  0x3d   :  { %v163_v44 = vpop.eup %162  ;;  %v84_v46 = vmul.f32 0.6931472, %v161_v39  ;;  %v89_v47 = vsub.f32 %v62_v28, %v80_v37  ;;  %v93_v48 = vmul.f32 %v87_v38, %v39_v31 }
  0x3e   :  { %v86_v50 = vmul.f32 0.6931472, %v163_v44  ;;  %v90_v51 = vsub.f32 %v64_v32, %v82_v42  ;;  %v94_v52 = vmul.f32 %v88_v43, %v40_v35 }
  0x3f   :  { %v91_v54 = vsub.f32 %v66_v36, %v84_v46  ;;  %v95_v55 = vmul.f32 %v89_v47, %v41_v40  ;;  %v99_v56 = vadd.f32 %v93_v48, %v76_v29 }
  0x40   :  { %v92_v57 = vsub.f32 %v68_v41, %v86_v50  ;;  %v96_v58 = vmul.f32 %v90_v51, %v42_v45  ;;  %v100_v59 = vadd.f32 %v94_v52, %v78_v33 }
  0x41   :  { %v97_v60 = vmul.f32 %v91_v54, %v43_v49  ;;  %v101_v61 = vadd.f32 %v95_v55, %v80_v37  ;;  %v106_v62 = vsel %vm105_vm0, %v99_v56, 0.0 }
  0x42   :  { %v98_v63 = vmul.f32 %v92_v57, %v44_v53  ;;  %v102_v0 = vadd.f32 %v96_v58, %v82_v42  ;;  %v107_v1 = vsel %vm105_vm0, %v100_v59, 0.0 }
  0x43   :  { %v103_v2 = vadd.f32 %v97_v60, %v84_v46  ;;  %v108_v3 = vadd.f32 %v107_v1, %v106_v62  ;;  %v109_v4 = vsel %vm105_vm0, %v101_v61, 0.0 }
  0x44   :  { %v104_v5 = vadd.f32 %v98_v63, %v86_v50  ;;  %v111_v6 = vsel %vm105_vm0, %v102_v0, 0.0 }
  0x45   :  { %v110_v7 = vadd.f32 %v109_v4, %v108_v3  ;;  %v113_v8 = vsel %vm105_vm0, %v103_v2, 0.0 }
  0x46   :  { %v115_v10 = vsel %vm105_vm0, %v104_v5, 0.0 }
  0x47   :  { %v112_v9 = vadd.f32 %v111_v6, %v110_v7 }
  0x49   :  { %v114_v11 = vadd.f32 %v113_v8, %v112_v9 }
  0x4b   :  { %v116_v12 = vadd.f32 %v115_v10, %v114_v11 }
  0x4d   :  { %117 = vadd.xlane.f32.xlu0 %v116_v12 }
  0xda   :  { %v118_v13 = vpop.xlane.xlu0 %117 }
  0xdb   :  { %v119_v14 = vrot.slane %v118_v13, 4 }
  0xdd   :  { %v120_v15 = vadd.f32 %v119_v14, %v118_v13 }
  0xdf   :  { %v121_v16 = vrot.slane %v120_v15, 2 }
  0xe1   :  { %v122_v17 = vadd.f32 %v121_v16, %v120_v15 }
  0xe3   :  { %v123_v18 = vrot.slane %v122_v17, 1 }
  0xe5   :  { %v124_v19 = vadd.f32 %v123_v18, %v122_v17 }
  0xe7   :  { %134 = vpush %v124_v19 }
 0x118   :  { %s135_s1 = spop %134 }
 0x119   :  { %v126_v20 = vstv %s135_s1 }
 0x11a   :  { %127 = vst [vmem:[%s266_s2] sm:$0xff] %v126_v20 }
 0x11b   :  { %132 = vsyncpa [#allocation3], 1 }
 0x11c   :  { %133 = vsyncpa [#allocation5], 1 }

</bundles_post_ra>
